<compile_context>
chip_gen: v7x
topology: tpu7x:2x2x1
jax: 0.10.0
libtpu: 0.0.40
codegen_flags: <defaults>
</compile_context>

<pallas_src>
import functools

import jax
import jax.numpy as jnp
from jax.experimental import pallas as pl
from jax.experimental.pallas import tpu as pltpu

INPUT_SIZE = 50
HIDDEN_SIZE = 100
FACTORS = 5

SUB = 8                      # sublane quantum
RHS_PAD = 128                # 100 hidden cols + 1 linear col + 5 factor cols -> 128 lanes
LIN_COL = HIDDEN_SIZE        # column holding the fused h @ w2 term
FAC_COL = HIDDEN_SIZE + 1    # first of the 5 factor columns

MAX_TB = 4096                # batch-tile ceiling
MIN_TB = 128                 # batch-tile floor (MXU / step-overhead friendly)
TARGET_STEPS = 8             # aim for ~8 grid steps (keeps both v7x TCs busy)


def _round_up(x, m):
    return (x + m - 1) // m * m


def _cdiv(a, b):
    return -(-a // b)


def fm_kernel(x_ref, r_ref, p_ref, b2_ref, o_ref):
    # Single fused MXU pass: y = x @ [W1 | W1@w2 | W1@v] + [b1 | b1@w2 | b1@v]
    y = jnp.dot(x_ref[...], r_ref[...], preferred_element_type=jnp.float32) + p_ref[0:1, :]
    a = p_ref[1:2, :]                      # per-lane linear coefficient
    b = p_ref[2:3, :]                      # per-lane quadratic coefficient
    contrib = y * (a + b * y)              # a*y + b*y^2, padded lanes contribute 0
    out = jnp.sum(contrib, axis=-1, keepdims=True) + b2_ref[0, 0]   # (tb, 1)
    o_ref[...] = out.astype(o_ref.dtype)


@functools.partial(jax.jit, static_argnames=("tb",))
def mymodel_forward(x, w1, b1, w2, b2, v, *, tb=None):
    f32 = jnp.float32
    B = x.shape[0]

    # ---- batch handling: keep x's feature dim unpadded (50 lanes in HBM);
    #      only round the batch up to a sublane multiple, and only if needed. ----
    x_f = jnp.asarray(x, f32)
    if B % SUB:
        b8 = _round_up(B, SUB)
        x_f = jnp.pad(x_f, ((0, b8 - B), (0, 0)))
    else:
        b8 = B

    # ---- batch-tile selection (ragged last block handled by the cdiv grid). ----
    if tb is None:
        tb_eff = _round_up(_cdiv(b8, TARGET_STEPS), SUB)
        tb_eff = min(MAX_TB, max(MIN_TB, tb_eff))
    else:
        tb_eff = _round_up(int(tb), SUB)
    tb_eff = min(tb_eff, b8)
    num_tiles = _cdiv(b8, tb_eff)

    # ---- one-time fused weights / coefficients (off the per-tile path). ----
    w1f = jnp.asarray(w1, f32)
    b1f = jnp.asarray(b1, f32).reshape(1, HIDDEN_SIZE)
    w2f = jnp.asarray(w2, f32).reshape(HIDDEN_SIZE, 1)
    vf = jnp.asarray(v, f32)

    R = jnp.zeros((INPUT_SIZE, RHS_PAD), f32)
    R = R.at[:, :HIDDEN_SIZE].set(w1f)
    R = R.at[:, LIN_COL:LIN_COL + 1].set(w1f @ w2f)
    R = R.at[:, FAC_COL:FAC_COL + FACTORS].set(w1f @ vf)

    beta = jnp.zeros((1, RHS_PAD), f32)
    beta = beta.at[:, :HIDDEN_SIZE].set(b1f)
    beta = beta.at[:, LIN_COL:LIN_COL + 1].set(b1f @ w2f)
    beta = beta.at[:, FAC_COL:FAC_COL + FACTORS].set(b1f @ vf)

    a_coef = jnp.zeros((1, RHS_PAD), f32).at[0, LIN_COL].set(1.0)
    b_coef = jnp.zeros((1, RHS_PAD), f32)
    b_coef = b_coef.at[:, :HIDDEN_SIZE].set(-0.5 * jnp.sum(vf * vf, axis=1)[None, :])
    b_coef = b_coef.at[:, FAC_COL:FAC_COL + FACTORS].set(0.5)

    P = jnp.concatenate([beta, a_coef, b_coef], axis=0)   # (3, 128): [beta; a; b]
    b2_s = jnp.asarray(b2, f32).reshape(1, 1)              # SMEM scalar

    out = pl.pallas_call(
        fm_kernel,
        out_shape=jax.ShapeDtypeStruct((b8, 1), f32),
        grid=(num_tiles,),
        in_specs=[
            pl.BlockSpec((tb_eff, INPUT_SIZE), lambda i: (i, 0)),    # x: streamed per tile
            pl.BlockSpec((INPUT_SIZE, RHS_PAD), lambda i: (0, 0)),   # R: VMEM-resident
            pl.BlockSpec((3, RHS_PAD), lambda i: (0, 0)),            # [beta; a; b]: VMEM-resident
            pl.BlockSpec(memory_space=pltpu.MemorySpace.SMEM),       # b2 scalar
        ],
        out_specs=pl.BlockSpec((tb_eff, 1), lambda i: (i, 0)),
        compiler_params=pltpu.CompilerParams(
            dimension_semantics=("parallel",),                       # megacore on v7x
        ),
    )(x_f, R, P, b2_s)

    return out[:B]


def init_params(key):
    k1, k2, k3, k4, k5 = jax.random.split(key, 5)
    # nn.Linear(INPUT_SIZE, HIDDEN_SIZE): uniform(-1/sqrt(in), 1/sqrt(in))
    bound1 = 1.0 / jnp.sqrt(jnp.float32(INPUT_SIZE))
    w1 = jax.random.uniform(k1, (INPUT_SIZE, HIDDEN_SIZE), jnp.float32, -bound1, bound1)
    b1 = jax.random.uniform(k2, (1, HIDDEN_SIZE), jnp.float32, -bound1, bound1)
    # FM linear: nn.Linear(HIDDEN_SIZE, 1)
    bound2 = 1.0 / jnp.sqrt(jnp.float32(HIDDEN_SIZE))
    w2 = jax.random.uniform(k3, (HIDDEN_SIZE, 1), jnp.float32, -bound2, bound2)
    b2 = jax.random.uniform(k4, (1, 1), jnp.float32, -bound2, bound2)
    # SecondOrderInteraction.v: uniform(-0.01, 0.01)
    v = jax.random.uniform(k5, (HIDDEN_SIZE, FACTORS), jnp.float32, -0.01, 0.01)
    return w1, b1, w2, b2, v


def reference_forward(x, w1, b1, w2, b2, v):
    """Pure-JAX reference matching the PyTorch loops (O(n^2) triu form)."""
    h = x @ w1 + b1
    lin = h @ w2 + b2
    M = v @ v.T  # (H, H)
    iu = jnp.triu(jnp.ones((HIDDEN_SIZE, HIDDEN_SIZE), jnp.float32), k=1)
    pair = (h[:, :, None] * h[:, None, :]) * M[None, :, :] * iu[None, :, :]
    inter = pair.sum(axis=(1, 2))[:, None]
    return lin + inter


if __name__ == "__main__":
    key = jax.random.PRNGKey(0)
    kx1, kx2, kp = jax.random.split(key, 3)

    w1, b1, w2, b2, v = init_params(kp)

    # Small batch (single tile; batch rounded 4 -> 8 internally).
    B1 = 4
    x1 = jax.random.normal(kx1, (B1, INPUT_SIZE), jnp.float32)
    out1 = jax.block_until_ready(mymodel_forward(x1, w1, b1, w2, b2, v))
    ref1 = reference_forward(x1, w1, b1, w2, b2, v)
    assert out1.shape == (B1, 1)
    assert jnp.allclose(out1, ref1, atol=1e-4, rtol=1e-4), (out1, ref1)

    # Larger non-multiple batch exercising the multi-step grid + ragged last block.
    B2 = 300
    x2 = jax.random.normal(kx2, (B2, INPUT_SIZE), jnp.float32)
    out2 = jax.block_until_ready(mymodel_forward(x2, w1, b1, w2, b2, v, tb=128))
    ref2 = reference_forward(x2, w1, b1, w2, b2, v)
    assert out2.shape == (B2, 1)
    assert jnp.allclose(out2, ref2, atol=1e-4, rtol=1e-4), (out2, ref2)

    print("KERNEL_OK")
</pallas_src>

<mosaic_0001>
module attributes {stable_mosaic.version = 11 : i64} {
  func.func @fm_kernel(%arg0: i32, %arg1: memref<8x50xf32, #tpu.memory_space<vmem>>, %arg2: memref<50x128xf32, #tpu.memory_space<vmem>>, %arg3: memref<3x128xf32, #tpu.memory_space<vmem>>, %arg4: memref<1x1xf32, #tpu.memory_space<smem>>, %arg5: memref<8x1xf32, #tpu.memory_space<vmem>>) attributes {dimension_semantics = [#tpu.dimension_semantics<parallel>], iteration_bounds = array<i64: 1>, scalar_prefetch = 0 : i64, scratch_operands = 0 : i64, tpu.core_type = #tpu.core_type<tc>, window_params = [{transform_indices = @transform_0, window_bounds = array<i64: 8, 50>}, {pipeline_mode = #tpu.pipeline_mode<synchronous>, transform_indices = @transform_1, window_bounds = array<i64: 50, 128>}, {pipeline_mode = #tpu.pipeline_mode<synchronous>, transform_indices = @transform_2, window_bounds = array<i64: 3, 128>}, {transform_indices = @transform_3, window_bounds = array<i64: 1, 1>}, {transform_indices = @transform_4, window_bounds = array<i64: 8, 1>}]} {
    %c0 = arith.constant 0 : index
    %c0_0 = arith.constant 0 : index
    %0 = vector.load %arg1[%c0, %c0_0] : memref<8x50xf32, #tpu.memory_space<vmem>>, vector<8x50xf32>
    %c0_1 = arith.constant 0 : index
    %c0_2 = arith.constant 0 : index
    %1 = vector.load %arg2[%c0_1, %c0_2] : memref<50x128xf32, #tpu.memory_space<vmem>>, vector<50x128xf32>
    %cst = arith.constant dense<0.000000e+00> : vector<8x128xf32>
    %2 = tpu.matmul %0, %1, %cst {dimension_numbers = #tpu.dot_dimension_numbers<[1], [0], [0], [1], [0, 0, 1, 1], [], []>} : vector<8x50xf32>, vector<50x128xf32>, vector<8x128xf32> -> vector<8x128xf32>
    %c0_3 = arith.constant 0 : index
    %c0_4 = arith.constant 0 : index
    %3 = vector.load %arg3[%c0_3, %c0_4] : memref<3x128xf32, #tpu.memory_space<vmem>>, vector<1x128xf32>
    %4 = vector.broadcast %3 : vector<1x128xf32> to vector<8x128xf32>
    %5 = arith.addf %2, %4 : vector<8x128xf32>
    %c1 = arith.constant 1 : index
    %c0_5 = arith.constant 0 : index
    %6 = vector.load %arg3[%c1, %c0_5] : memref<3x128xf32, #tpu.memory_space<vmem>>, vector<1x128xf32>
    %c2 = arith.constant 2 : index
    %c0_6 = arith.constant 0 : index
    %7 = vector.load %arg3[%c2, %c0_6] : memref<3x128xf32, #tpu.memory_space<vmem>>, vector<1x128xf32>
    %8 = vector.broadcast %7 : vector<1x128xf32> to vector<8x128xf32>
    %9 = arith.mulf %8, %5 : vector<8x128xf32>
    %10 = vector.broadcast %6 : vector<1x128xf32> to vector<8x128xf32>
    %11 = arith.addf %10, %9 : vector<8x128xf32>
    %12 = arith.mulf %5, %11 : vector<8x128xf32>
    %cst_7 = arith.constant dense<0.000000e+00> : vector<8xf32>
    %13 = vector.multi_reduction <add>, %12, %cst_7 [1] : vector<8x128xf32> to vector<8xf32>
    %14 = vector.shape_cast %13 : vector<8xf32> to vector<8x1xf32>
    %c0_8 = arith.constant 0 : index
    %c0_9 = arith.constant 0 : index
    %15 = memref.load %arg4[%c0_8, %c0_9] : memref<1x1xf32, #tpu.memory_space<smem>>
    %16 = vector.broadcast %15 : f32 to vector<8x1xf32>
    %17 = arith.addf %14, %16 : vector<8x1xf32>
    %c0_10 = arith.constant 0 : index
    %c0_11 = arith.constant 0 : index
    %18 = vector.load %arg5[%c0_10, %c0_11] : memref<8x1xf32, #tpu.memory_space<vmem>>, vector<8x1xf32>
    tpu.vector_store %arg5[%c0_10, %c0_11], %17 {strides = array<i32>} : memref<8x1xf32, #tpu.memory_space<vmem>>, vector<8x1xf32>,
    return
  }
  func.func @transform_0(%arg0: i32) -> (i32, i32) {
    %c0_i32 = arith.constant 0 : i32
    %c0_i32_0 = arith.constant 0 : i32
    return %arg0, %c0_i32 : i32, i32
  }
  func.func @transform_1(%arg0: i32) -> (i32, i32) {
    %c0_i32 = arith.constant 0 : i32
    %c0_i32_0 = arith.constant 0 : i32
    %c0_i32_1 = arith.constant 0 : i32
    return %c0_i32, %c0_i32_0 : i32, i32
  }
  func.func @transform_2(%arg0: i32) -> (i32, i32) {
    %c0_i32 = arith.constant 0 : i32
    %c0_i32_0 = arith.constant 0 : i32
    %c0_i32_1 = arith.constant 0 : i32
    return %c0_i32, %c0_i32_0 : i32, i32
  }
  func.func @transform_3(%arg0: i32) -> (i32, i32) {
    %c0_i32 = arith.constant 0 : i32
    %c0_i32_0 = arith.constant 0 : i32
    %c0_i32_1 = arith.constant 0 : i32
    return %c0_i32, %c0_i32_0 : i32, i32
  }
  func.func @transform_4(%arg0: i32) -> (i32, i32) {
    %c0_i32 = arith.constant 0 : i32
    %c0_i32_0 = arith.constant 0 : i32
    return %arg0, %c0_i32 : i32, i32
  }
}

</mosaic_0001>

<bundles_post_ra>
// kernel: mymodel_forward.1
= control target key start
LH: loop header
LB: loop body
LE: loop exit
PB: predicated region body
PF: predicated region fallthrough
CT: control target
= control target key end

     0   :  { %v175_v0 = vmov 0.0|0.0   ;;  %vm176_vm0 = vmmov 0   ;;  %v177_v4 = vmov 0.0   ;;  %vm35_vm1 = vcmask 1041408   ;;  %s242_s1 = inlined_call_operand.vmem [shape: f32[50,128], index: 1, kind: input, shape index: {}]   ;;  %s243_s0 = inlined_call_operand.vmem [shape: f32[8,50], index: 0, kind: input, shape index: {}]   ;;  %s244_s2 = inlined_call_operand.vmem [shape: f32[3,128], index: 2, kind: input, shape index: {}]   ;;  %s245_s3 = inlined_call_operand.<no memory space> [shape: f32[1,1], index: 3, kind: input, shape index: {}]   ;;  %s246_s4 = inlined_call_operand.vmem [shape: f32[8,1], index: 4, kind: output, shape index: {}]  }
   0x1   :  { %163 = vmatprep.subr.bf16.mxu0 %v175_v0  ;;  %v19_v1 = vld [vmem:[%s242_s1] sm:$0xff]  ;;  %v20_v2 = vld [vmem:[%s242_s1 + $0x8] sm:$0xff]  ;;  %v21_v3 = vld [vmem:[%s242_s1 + $0x10] sm:$0xff]  ;;  %160 = vmatprep.mubr.msk.f32.mxu0 %vm176_vm0, %v177_v4  ;;  %vm31_vm2 = vcmask 408576   ;;  %v125_v22 = vstv %s245_s3  ;;  %vm127_vm3 = vcmask 7168  }
   0x2   :  { %v164_v5 = vpack.c.bf16 %v20_v2, %v19_v1  ;;  %v22_v6 = vld [vmem:[%s242_s1 + $0x18] sm:$0xff]  ;;  %v23_v8 = vld [vmem:[%s242_s1 + $0x20] sm:$0xff]  ;;  %v24_v9 = vld [vmem:[%s242_s1 + $0x28] sm:$0xff] }
   0x3   :  { %v167_v7 = vpack.c.bf16 %v22_v6, %v21_v3  ;;  %v170_v10 = vpack.c.bf16 %v24_v9, %v23_v8  ;;  %v25_v11 = vld [vmem:[%s242_s1 + $0x30] sm:$0x3]  ;;  %v18_v12 = vld [vmem:[%s243_s0] sm:$0xff] }
   0x4   :  { %165 = vmatpush3.bf16.msra.mxu0 %v164_v5  ;;  %v133_v13 = vld [vmem:[%s244_s2] ss:$0 sm:$0xff]  ;;  %v136_v15 = vld [vmem:[%s244_s2 + $0x2] ss:$0 sm:$0xff]  ;;  %v137_v18 = vld [vmem:[%s244_s2 + $0x1] ss:$0 sm:$0xff] }
   0x5   :  { %166 = vmatprep.subr.bf16.mxu0 %v175_v0 }
   0x8   :  { %168 = vmatpush3.bf16.msra.mxu0 %v167_v7 }
   0x9   :  { %169 = vmatprep.subr.bf16.mxu0 %v175_v0 }
   0xc   :  { %171 = vmatpush3.bf16.msra.mxu0 %v170_v10 }
   0xd   :  { %158 = vmatprep.subr.mxu0 %v177_v4 }
  0x10   :  { %159 = vmatpush3.msk.msra.mxu0 %vm35_vm1, %v25_v11 }
  0x11   :  { %161 = vmatmul.mubr.msk.f32.vlgmr.msra.gmra.mrb[0].mxu0 %vm31_vm2, %v18_v12 }
  0xe4   :  { %v105_v14 = vpop.f32.mrb[0].mxu0 }
  0xe5   :  { %v106_v16 = vadd.f32 %v133_v13, %v105_v14  ;;  %v162_v17 = vpop.f32.mrb[1].mxu0 }
  0xe7   :  { %v115_v19 = vmul.f32 %v136_v15, %v106_v16 }
  0xe9   :  { %v120_v20 = vadd.f32 %v137_v18, %v115_v19 }
  0xeb   :  { %v121_v21 = vmul.f32 %v120_v20, %v106_v16 }
  0xed   :  { %122 = vadd.xlane.f32.xlu0 %v121_v21 }
 0x17a   :  { %v123_v23 = vpop.xlane.xlu0 %122 }
 0x17b   :  { %v126_v24 = vadd.f32 %v125_v22, %v123_v23 }
 0x17d   :  { %128 = vst.msk [vmem:[%s246_s4] sm:$0xff] %vm127_vm3, %v126_v24 }

</bundles_post_ra>
